<compile_context>
chip_gen: v7x
topology: tpu7x:2x2x1
jax: 0.10.0
libtpu: 0.0.40
codegen_flags: <defaults>
</compile_context>

<pallas_src>
import jax
import jax.numpy as jnp
import numpy as np
from jax.experimental import pallas as pl
from jax.experimental.pallas import tpu as pltpu

EPS = 1e-5


def encoder_kernel(x_ref, w_ref, bn_ref, o_ref):
    # x_ref : (N, Cin, P)    pixels on the lane axis (P multiple of 128)
    # w_ref : (3, Cout, Cin) packed conv weights (PyTorch (out,in) layout)
    # bn_ref: (Cout, 4)      columns = [gamma1, beta1, gamma2, beta2]
    # o_ref : (N, Cout, P)
    N, _, P = x_ref.shape
    inv_count = 1.0 / (N * P)

    w1 = w_ref[0]
    w2 = w_ref[1]
    w3 = w_ref[2]
    g1 = bn_ref[:, 0:1]          # (Cout, 1) - channels on sublanes, broadcast
    b1 = bn_ref[:, 1:2]          # directly against the (Cout, N*P) tile below
    g2 = bn_ref[:, 2:3]
    b2 = bn_ref[:, 3:4]

    # Batch the N samples along lanes: (Cin, N*P). Static lane concat of two
    # lane-aligned (Cin, P) tiles -> essentially free register placement.
    xcat = jnp.concatenate([x_ref[n] for n in range(N)], axis=-1)

    def bn_relu(h, gamma, beta):
        # One-pass batch stats over the whole (Cout, N*P) tile; the lane
        # reduction goes to the otherwise-idle XLU (separate VLIW slot).
        s = jnp.sum(h, axis=-1, keepdims=True)           # (Cout, 1)
        ss = jnp.sum(h * h, axis=-1, keepdims=True)      # (Cout, 1)
        mu = s * inv_count
        var = jnp.maximum(ss * inv_count - mu * mu, 0.0)  # biased variance
        scale = gamma * jax.lax.rsqrt(var + EPS)
        shift = beta - mu * scale
        # Single fused scale/shift + ReLU pass per element.
        return jnp.maximum(h * scale + shift, 0.0)

    # One MXU matmul per layer on the batched (Cin, N*P) operand.
    h = jnp.dot(w1, xcat, preferred_element_type=jnp.float32)   # conv1
    h = bn_relu(h, g1, b1)                                       # bn1 + relu1
    h = jnp.dot(w2, h, preferred_element_type=jnp.float32)      # conv2
    h = bn_relu(h, g2, b2)                                       # bn2 + relu2
    h = jnp.dot(w3, h, preferred_element_type=jnp.float32)      # conv3

    # Split back into per-sample static lane slices (multiples of 128).
    for n in range(N):
        o_ref[n] = h[:, n * P:(n + 1) * P]


def encoder_forward(x_nchw, params):
    """x_nchw: (N, C_in, H, W) float32. params: (w_packed(3,C,C), bn(C,4))."""
    w_all, bn = params
    N, Cin, H, W = x_nchw.shape
    Cout = w_all.shape[1]
    P = H * W

    # NCHW -> (N, C, H*W): contiguous reshape, no HBM transpose.
    x3d = x_nchw.reshape(N, Cin, P)

    vmem = pl.BlockSpec(memory_space=pltpu.MemorySpace.VMEM)
    out3d = pl.pallas_call(
        encoder_kernel,
        out_shape=jax.ShapeDtypeStruct((N, Cout, P), jnp.float32),
        in_specs=[vmem, vmem, vmem],   # gridless: whole arrays land in VMEM
        out_specs=vmem,
    )(x3d, w_all, bn)

    # (N, Cout, H*W) -> (N, Cout, H, W): contiguous reshape, no transpose.
    return out3d.reshape(N, Cout, H, W)


def encoder_reference(x_nchw, params):
    """Pure-JAX reference mirroring the PyTorch forward (training-mode BN)."""
    w_all, bn = params
    w1, w2, w3 = w_all[0], w_all[1], w_all[2]
    g1, b1, g2, b2 = bn[:, 0], bn[:, 1], bn[:, 2], bn[:, 3]

    def conv1x1(x, w):
        return jnp.einsum('oi,nihw->nohw', w, x)

    def bn_relu(y, gamma, beta):
        mu = jnp.mean(y, axis=(0, 2, 3), keepdims=True)
        var = jnp.mean((y - mu) ** 2, axis=(0, 2, 3), keepdims=True)
        yh = (y - mu) * jax.lax.rsqrt(var + EPS)
        return jnp.maximum(
            yh * gamma.reshape(1, -1, 1, 1) + beta.reshape(1, -1, 1, 1), 0.0)

    h = bn_relu(conv1x1(x_nchw, w1), g1, b1)
    h = bn_relu(conv1x1(h, w2), g2, b2)
    return conv1x1(h, w3)


def make_params(key, in_plane, out_plane):
    # Module only works when in_plane == out_plane (bn sized to in_plane).
    assert in_plane == out_plane
    ks = jax.random.split(key, 7)
    # PyTorch conv weight is (out, in, 1, 1); we keep (out, in).
    w1 = 0.1 * jax.random.normal(ks[0], (out_plane, in_plane), jnp.float32)
    w2 = 0.1 * jax.random.normal(ks[1], (out_plane, out_plane), jnp.float32)
    w3 = 0.1 * jax.random.normal(ks[2], (out_plane, out_plane), jnp.float32)
    g1 = 1.0 + 0.1 * jax.random.normal(ks[3], (out_plane,), jnp.float32)
    b1 = 0.1 * jax.random.normal(ks[4], (out_plane,), jnp.float32)
    g2 = 1.0 + 0.1 * jax.random.normal(ks[5], (out_plane,), jnp.float32)
    b2 = 0.1 * jax.random.normal(ks[6], (out_plane,), jnp.float32)
    w_all = jnp.stack([w1, w2, w3], axis=0)        # (3, Cout, Cin)
    bn = jnp.stack([g1, b1, g2, b2], axis=1)       # (Cout, 4)
    return (w_all, bn)


if __name__ == "__main__":
    key = jax.random.PRNGKey(0)
    k_x, k_p = jax.random.split(key)

    N, C, H, W = 2, 8, 16, 16          # in_plane == out_plane == 8
    x = jax.random.normal(k_x, (N, C, H, W), jnp.float32)
    params = make_params(k_p, C, C)

    out = jax.block_until_ready(encoder_forward(x, params))
    ref = jax.block_until_ready(encoder_reference(x, params))

    assert out.shape == (N, C, H, W)
    np.testing.assert_allclose(np.asarray(out), np.asarray(ref),
                               rtol=1e-4, atol=1e-4)
    print("KERNEL_OK")
</pallas_src>

<mosaic_0001>
module attributes {stable_mosaic.version = 11 : i64} {
  func.func @encoder_kernel(%arg0: memref<2x8x256xf32, #tpu.memory_space<vmem>>, %arg1: memref<3x8x8xf32, #tpu.memory_space<vmem>>, %arg2: memref<8x4xf32, #tpu.memory_space<vmem>>, %arg3: memref<2x8x256xf32, #tpu.memory_space<vmem>>) attributes {dimension_semantics = [], scalar_prefetch = 0 : i64, scratch_operands = 0 : i64, tpu.core_type = #tpu.core_type<tc>} {
    %c0 = arith.constant 0 : index
    %c0_0 = arith.constant 0 : index
    %c0_1 = arith.constant 0 : index
    %0 = vector.load %arg1[%c0, %c0_0, %c0_1] : memref<3x8x8xf32, #tpu.memory_space<vmem>>, vector<1x8x8xf32>
    %1 = vector.shape_cast %0 : vector<1x8x8xf32> to vector<8x8xf32>
    %c1 = arith.constant 1 : index
    %c0_2 = arith.constant 0 : index
    %c0_3 = arith.constant 0 : index
    %2 = vector.load %arg1[%c1, %c0_2, %c0_3] : memref<3x8x8xf32, #tpu.memory_space<vmem>>, vector<1x8x8xf32>
    %3 = vector.shape_cast %2 : vector<1x8x8xf32> to vector<8x8xf32>
    %c2 = arith.constant 2 : index
    %c0_4 = arith.constant 0 : index
    %c0_5 = arith.constant 0 : index
    %4 = vector.load %arg1[%c2, %c0_4, %c0_5] : memref<3x8x8xf32, #tpu.memory_space<vmem>>, vector<1x8x8xf32>
    %5 = vector.shape_cast %4 : vector<1x8x8xf32> to vector<8x8xf32>
    %c0_6 = arith.constant 0 : index
    %c0_7 = arith.constant 0 : index
    %6 = vector.load %arg2[%c0_6, %c0_7] : memref<8x4xf32, #tpu.memory_space<vmem>>, vector<8x1xf32>
    %c0_8 = arith.constant 0 : index
    %c1_9 = arith.constant 1 : index
    %7 = vector.load %arg2[%c0_8, %c1_9] : memref<8x4xf32, #tpu.memory_space<vmem>>, vector<8x1xf32>
    %c0_10 = arith.constant 0 : index
    %c2_11 = arith.constant 2 : index
    %8 = vector.load %arg2[%c0_10, %c2_11] : memref<8x4xf32, #tpu.memory_space<vmem>>, vector<8x1xf32>
    %c0_12 = arith.constant 0 : index
    %c3 = arith.constant 3 : index
    %9 = vector.load %arg2[%c0_12, %c3] : memref<8x4xf32, #tpu.memory_space<vmem>>, vector<8x1xf32>
    %c0_13 = arith.constant 0 : index
    %c0_14 = arith.constant 0 : index
    %c0_15 = arith.constant 0 : index
    %10 = vector.load %arg0[%c0_13, %c0_14, %c0_15] : memref<2x8x256xf32, #tpu.memory_space<vmem>>, vector<1x8x256xf32>
    %11 = vector.shape_cast %10 : vector<1x8x256xf32> to vector<8x256xf32>
    %c1_16 = arith.constant 1 : index
    %c0_17 = arith.constant 0 : index
    %c0_18 = arith.constant 0 : index
    %12 = vector.load %arg0[%c1_16, %c0_17, %c0_18] : memref<2x8x256xf32, #tpu.memory_space<vmem>>, vector<1x8x256xf32>
    %13 = vector.shape_cast %12 : vector<1x8x256xf32> to vector<8x256xf32>
    %14 = tpu.concatenate %11, %13 in 1 : vector<8x256xf32>, vector<8x256xf32> -> vector<8x512xf32>
    %cst = arith.constant dense<0.000000e+00> : vector<8x512xf32>
    %15 = tpu.matmul %1, %14, %cst {dimension_numbers = #tpu.dot_dimension_numbers<[1], [0], [0], [1], [0, 0, 1, 1], [], []>} : vector<8x8xf32>, vector<8x512xf32>, vector<8x512xf32> -> vector<8x512xf32>
    %cst_19 = arith.constant dense<0.000000e+00> : vector<8xf32>
    %16 = vector.multi_reduction <add>, %15, %cst_19 [1] : vector<8x512xf32> to vector<8xf32>
    %17 = vector.shape_cast %16 : vector<8xf32> to vector<8x1xf32>
    %18 = arith.mulf %15, %15 : vector<8x512xf32>
    %cst_20 = arith.constant dense<0.000000e+00> : vector<8xf32>
    %19 = vector.multi_reduction <add>, %18, %cst_20 [1] : vector<8x512xf32> to vector<8xf32>
    %20 = vector.shape_cast %19 : vector<8xf32> to vector<8x1xf32>
    %cst_21 = arith.constant 0.001953125 : f32
    %21 = vector.broadcast %cst_21 : f32 to vector<8x1xf32>
    %22 = arith.mulf %17, %21 : vector<8x1xf32>
    %cst_22 = arith.constant 0.001953125 : f32
    %23 = vector.broadcast %cst_22 : f32 to vector<8x1xf32>
    %24 = arith.mulf %20, %23 : vector<8x1xf32>
    %25 = arith.mulf %22, %22 : vector<8x1xf32>
    %26 = arith.subf %24, %25 : vector<8x1xf32>
    %cst_23 = arith.constant 0.000000e+00 : f32
    %27 = vector.broadcast %cst_23 : f32 to vector<8x1xf32>
    %28 = arith.maximumf %26, %27 : vector<8x1xf32>
    %cst_24 = arith.constant 9.99999974E-6 : f32
    %29 = vector.broadcast %cst_24 : f32 to vector<8x1xf32>
    %30 = arith.addf %28, %29 : vector<8x1xf32>
    %31 = math.rsqrt %30 : vector<8x1xf32>
    %32 = arith.mulf %6, %31 : vector<8x1xf32>
    %33 = arith.mulf %22, %32 : vector<8x1xf32>
    %34 = arith.subf %7, %33 : vector<8x1xf32>
    %35 = vector.broadcast %32 : vector<8x1xf32> to vector<8x512xf32>
    %36 = arith.mulf %15, %35 : vector<8x512xf32>
    %37 = vector.broadcast %34 : vector<8x1xf32> to vector<8x512xf32>
    %38 = arith.addf %36, %37 : vector<8x512xf32>
    %cst_25 = arith.constant 0.000000e+00 : f32
    %39 = vector.broadcast %cst_25 : f32 to vector<8x512xf32>
    %40 = arith.maximumf %38, %39 : vector<8x512xf32>
    %cst_26 = arith.constant dense<0.000000e+00> : vector<8x512xf32>
    %41 = tpu.matmul %3, %40, %cst_26 {dimension_numbers = #tpu.dot_dimension_numbers<[1], [0], [0], [1], [0, 0, 1, 1], [], []>} : vector<8x8xf32>, vector<8x512xf32>, vector<8x512xf32> -> vector<8x512xf32>
    %cst_27 = arith.constant dense<0.000000e+00> : vector<8xf32>
    %42 = vector.multi_reduction <add>, %41, %cst_27 [1] : vector<8x512xf32> to vector<8xf32>
    %43 = vector.shape_cast %42 : vector<8xf32> to vector<8x1xf32>
    %44 = arith.mulf %41, %41 : vector<8x512xf32>
    %cst_28 = arith.constant dense<0.000000e+00> : vector<8xf32>
    %45 = vector.multi_reduction <add>, %44, %cst_28 [1] : vector<8x512xf32> to vector<8xf32>
    %46 = vector.shape_cast %45 : vector<8xf32> to vector<8x1xf32>
    %cst_29 = arith.constant 0.001953125 : f32
    %47 = vector.broadcast %cst_29 : f32 to vector<8x1xf32>
    %48 = arith.mulf %43, %47 : vector<8x1xf32>
    %cst_30 = arith.constant 0.001953125 : f32
    %49 = vector.broadcast %cst_30 : f32 to vector<8x1xf32>
    %50 = arith.mulf %46, %49 : vector<8x1xf32>
    %51 = arith.mulf %48, %48 : vector<8x1xf32>
    %52 = arith.subf %50, %51 : vector<8x1xf32>
    %cst_31 = arith.constant 0.000000e+00 : f32
    %53 = vector.broadcast %cst_31 : f32 to vector<8x1xf32>
    %54 = arith.maximumf %52, %53 : vector<8x1xf32>
    %cst_32 = arith.constant 9.99999974E-6 : f32
    %55 = vector.broadcast %cst_32 : f32 to vector<8x1xf32>
    %56 = arith.addf %54, %55 : vector<8x1xf32>
    %57 = math.rsqrt %56 : vector<8x1xf32>
    %58 = arith.mulf %8, %57 : vector<8x1xf32>
    %59 = arith.mulf %48, %58 : vector<8x1xf32>
    %60 = arith.subf %9, %59 : vector<8x1xf32>
    %61 = vector.broadcast %58 : vector<8x1xf32> to vector<8x512xf32>
    %62 = arith.mulf %41, %61 : vector<8x512xf32>
    %63 = vector.broadcast %60 : vector<8x1xf32> to vector<8x512xf32>
    %64 = arith.addf %62, %63 : vector<8x512xf32>
    %cst_33 = arith.constant 0.000000e+00 : f32
    %65 = vector.broadcast %cst_33 : f32 to vector<8x512xf32>
    %66 = arith.maximumf %64, %65 : vector<8x512xf32>
    %cst_34 = arith.constant dense<0.000000e+00> : vector<8x512xf32>
    %67 = tpu.matmul %5, %66, %cst_34 {dimension_numbers = #tpu.dot_dimension_numbers<[1], [0], [0], [1], [0, 0, 1, 1], [], []>} : vector<8x8xf32>, vector<8x512xf32>, vector<8x512xf32> -> vector<8x512xf32>
    %68 = vector.extract_strided_slice %67 {offsets = [0, 0], sizes = [8, 256], strides = [1, 1]} : vector<8x512xf32> to vector<8x256xf32>
    %c0_35 = arith.constant 0 : index
    %c0_36 = arith.constant 0 : index
    %c0_37 = arith.constant 0 : index
    %69 = vector.load %arg3[%c0_35, %c0_36, %c0_37] : memref<2x8x256xf32, #tpu.memory_space<vmem>>, vector<1x8x256xf32>
    %70 = vector.shape_cast %69 : vector<1x8x256xf32> to vector<8x256xf32>
    %71 = vector.shape_cast %68 : vector<8x256xf32> to vector<1x8x256xf32>
    tpu.vector_store %arg3[%c0_35, %c0_36, %c0_37], %71 {strides = array<i32>} : memref<2x8x256xf32, #tpu.memory_space<vmem>>, vector<1x8x256xf32>,
    %72 = vector.extract_strided_slice %67 {offsets = [0, 256], sizes = [8, 256], strides = [1, 1]} : vector<8x512xf32> to vector<8x256xf32>
    %c1_38 = arith.constant 1 : index
    %c0_39 = arith.constant 0 : index
    %c0_40 = arith.constant 0 : index
    %73 = vector.load %arg3[%c1_38, %c0_39, %c0_40] : memref<2x8x256xf32, #tpu.memory_space<vmem>>, vector<1x8x256xf32>
    %74 = vector.shape_cast %73 : vector<1x8x256xf32> to vector<8x256xf32>
    %75 = vector.shape_cast %72 : vector<8x256xf32> to vector<1x8x256xf32>
    tpu.vector_store %arg3[%c1_38, %c0_39, %c0_40], %75 {strides = array<i32>} : memref<2x8x256xf32, #tpu.memory_space<vmem>>, vector<1x8x256xf32>,
    return
  }
}

</mosaic_0001>

<bundles_post_ra>
// kernel: tpu_custom_call.1
= control target key start
LH: loop header
LB: loop body
LE: loop exit
PB: predicated region body
PF: predicated region fallthrough
CT: control target
= control target key end

     0   :  { %8 = vsyncpa [#allocation3], 0  ;;  %s810_s0 = inlined_call_operand.hbm [shape: f32[2,8,256], index: 0, kind: input, shape index: {}]   ;;  %s811_s1 = inlined_call_operand.hbm [shape: f32[3,8,8], index: 1, kind: input, shape index: {}]   ;;  %s812_s2 = inlined_call_operand.vmem [shape: f32[8,4], index: 2, kind: input, shape index: {}]   ;;  %s813_s3 = inlined_call_operand.hbm [shape: f32[2,8,256], index: 3, kind: output, shape index: {}]  }
   0x1   :  { %9 = vsyncpa [#allocation6], 0 }
   0x2   :  { %10 = vsyncpa [#allocation4], 0  ;;  %s712_s12 = smov [#allocation2]   ;;  %s640_s16 = scalar_lea.hbm %s810_s0, 512 }
   0x3   :  { %s16_s13 = sshll.u32 %s712_s12, 4  ;;  %p641_p0 = scmp.ne.s32.totalorder %s810_s0, %s640_s16  ;;  %s17_s13 = int_to_ptr.vmem [resolvable:$true] %s16_s13 }
   0x4   :  { %p644_p1 = scmp.lt.u32.totalorder %s640_s16, %s810_s0 }
   0x6   :  { %p646_p2 = pnand %p644_p1, %p641_p0 }
   0x8   :  { %649 = shalt.err (!%p646_p2)
}
   0x9   :  { %s650_s21 = scalar_lea.vmem %s17_s13, 512  ;;  %p655_p4 = scmp.lt.s32.totalorder %s17_s13, %s17_s13 }
   0xa   :  { %p651_p3 = scmp.ne.s32.totalorder %s17_s13, %s650_s21  ;;  %p656_p5 = scmp.lt.s32.totalorder %s650_s21, %s650_s21 }
   0xc   :  { %p657_p6 = por %p656_p5, %p655_p4 }
   0xe   :  { %p658_p7 = pnand %p657_p6, %p651_p3 }
  0x10   :  { %661 = shalt.err (!%p658_p7)
}
  0x11   :  { %s713_s22 = smov 256   ;;  %s714_s23 = smov 16  }
  0x12   :  { %22 = dma.hbm_to_vmem [thread:$0]  %s810_s0, 512, %s17_s13, [#allocation3], %s713_s22, %s713_s22, %s714_s23  }
  0x13   :  { %s715_s26 = smov [#allocation5]   ;;  %s662_s30 = scalar_lea.hbm %s811_s1, 384 }
  0x14   :  { %s28_s27 = sshll.u32 %s715_s26, 4  ;;  %p663_p8 = scmp.ne.s32.totalorder %s811_s1, %s662_s30  ;;  %s29_s27 = int_to_ptr.vmem [resolvable:$true] %s28_s27 }
  0x15   :  { %p666_p9 = scmp.lt.u32.totalorder %s662_s30, %s811_s1 }
  0x17   :  { %p668_p10 = pnand %p666_p9, %p663_p8 }
  0x19   :  { %671 = shalt.err (!%p668_p10)
}
  0x1a   :  { %s672_s8 = scalar_lea.vmem %s29_s27, 384  ;;  %p677_p12 = scmp.lt.s32.totalorder %s29_s27, %s29_s27 }
  0x1b   :  { %p673_p11 = scmp.ne.s32.totalorder %s29_s27, %s672_s8  ;;  %p678_p13 = scmp.lt.s32.totalorder %s672_s8, %s672_s8 }
  0x1d   :  { %p679_p0 = por %p678_p13, %p677_p12 }
  0x1f   :  { %p680_p1 = pnand %p679_p0, %p673_p11 }
  0x21   :  { %683 = shalt.err (!%p680_p1)
}
  0x22   :  { %s716_s0 = smov 128   ;;  %s717_s9 = smov 8  }
  0x23   :  { %34 = dma.hbm_to_vmem [thread:$0]  %s811_s1, 384, %s29_s27, [#allocation6], %s716_s0, %s716_s0, %s717_s9  }
  0x24   :  { %706 = dma.done.wait [#allocation3], 512  }
  0x25   :  { %707 = vsyncadd [#allocation3], 4294966784 }
  0x26   :  { %708 = dma.done.wait [#allocation6], 384  }
  0x27   :  { %709 = vsyncadd [#allocation6], 4294966912  ;;  %v718_v0 = vmov 0.0   ;;  %v50_v1 = vld [vmem:[#allocation2 + $0x8] sm:$0xff]  ;;  %v49_v2 = vld [vmem:[#allocation2] sm:$0xff]  ;;  %vm54_vm0 = vcmask 64512  }
  0x28   :  { %122 = vmatprep.mubr.f32.mxu0 %v718_v0  ;;  %193 = vmatprep.mubr.f32.mxu1 %v718_v0  ;;  %v43_v3 = vld [vmem:[#allocation5] sm:$0xff]  ;;  %v53_v4 = vld [vmem:[#allocation2 + $0x18] sm:$0xff]  ;;  %v52_v5 = vld [vmem:[#allocation2 + $0x10] sm:$0xff]  ;;  %v719_v20 = vmov 0   ;;  %v720_v29 = vmov 1   ;;  %s721_s13 = smov 1  }
  0x29   :  { %58 = vmatprep.subr.mxu0 %v50_v1  ;;  %129 = vmatprep.subr.mxu1 %v53_v4  ;;  %v781_v30 = vld [vmem:[%s812_s2] sm:$0xff]  ;;  %v45_v50 = vld [vmem:[#allocation5 + $0x8] sm:$0xff]  ;;  %s724_s2 = smov [#allocation7]  }
  0x2a   :  { %59 = vmatpush1.msra.mxu0 %v49_v2  ;;  %130 = vmatpush1.msra.mxu1 %v52_v5  ;;  %v722_v2 = vmov 2   ;;  %s600_s14 = sshll.u32 %s724_s2, 4  ;;  %s601_s14 = int_to_ptr.vmem [resolvable:$true] %s600_s14 }
  0x2b   :  { %613 = vmatmul.mubr.msk.f32.vlgmr.msra.gmra.mrb[0].mxu0 %vm54_vm0, %v43_v3  ;;  %614 = vmatmul.mubr.msk.f32.vlgmr.msra.gmra.mrb[0].mxu1 %vm54_vm0, %v43_v3  ;;  %s684_s15 = scalar_lea.vmem %s601_s14, 512  ;;  %p689_p3 = scmp.lt.s32.totalorder %s601_s14, %s601_s14 }
  0x2c   :  { %317 = vmatprep.mubr.f32.mxu0 %v718_v0  ;;  %388 = vmatprep.mubr.f32.mxu1 %v718_v0  ;;  %p685_p2 = scmp.ne.s32.totalorder %s601_s14, %s684_s15  ;;  %p690_p4 = scmp.lt.s32.totalorder %s684_s15, %s684_s15 }
  0x2d   :  { %632 = vset.pattern.permute.xlu1 %v719_v20  ;;  %633 = vset.pattern.permute.xlu0 %v720_v29 }
  0x2e   :  { %p691_p5 = por %p690_p4, %p689_p3 }
  0x30   :  { %p692_p6 = pnand %p691_p5, %p685_p2 }
  0xfe   :  { %v124_v6 = vpop.f32.mrb[0].mxu0  ;;  %v195_v9 = vpop.f32.mrb[0].mxu1 }
  0xff   :  { %v205_v7 = vmul.f32 %v124_v6, %v124_v6  ;;  %v126_v8 = vpop.f32.mrb[1].mxu0  ;;  %v207_v12 = vmul.f32 %v195_v9, %v195_v9  ;;  %v197_v13 = vpop.f32.mrb[1].mxu1 }
 0x100   :  { %v200_v10 = vadd.f32 %v126_v8, %v124_v6  ;;  %v206_v11 = vmul.f32 %v126_v8, %v126_v8  ;;  %v208_v17 = vmul.f32 %v197_v13, %v197_v13 }
 0x102   :  { %v201_v14 = vadd.f32 %v200_v10, %v195_v9  ;;  %v209_v15 = vadd.f32 %v206_v11, %v205_v7 }
 0x104   :  { %v202_v16 = vadd.f32 %v201_v14, %v197_v13  ;;  %v210_v18 = vadd.f32 %v209_v15, %v207_v12 }
 0x106   :  { %203 = vadd.xlane.f32.xlu0 %v202_v16  ;;  %v211_v19 = vadd.f32 %v210_v18, %v208_v17 }
 0x10a   :  { %212 = vadd.xlane.f32.xlu0 %v211_v19 }
 0x193   :  { %v204_v21 = vpop.xlane.xlu0 %203 }
 0x194   :  { %v214_v22 = vmul.f32 0.001953125, %v204_v21 }
 0x196   :  { %v216_v24 = vmul.f32 %v214_v22, %v214_v22 }
 0x197   :  { %v213_v23 = vpop.xlane.xlu0 %212 }
 0x198   :  { %v215_v25 = vmul.f32 0.001953125, %v213_v23 }
 0x19a   :  { %v217_v26 = vsub.f32 %v215_v25, %v216_v24 }
 0x19c   :  { %v218_v27 = vmax.f32 %v217_v26, 0.0 }
 0x19e   :  { %v219_v28 = vadd.f32 1e-05, %v218_v27 }
 0x1a0   :  { %636 = vrsqrt.f32 %v219_v28 }
 0x1aa   :  { %v637_v31 = vpop.eup %636 }
 0x1ab   :  { %v221_v32 = vmul.f32 %v637_v31, %v781_v30  ;;  %v47_v31 = vld [vmem:[#allocation5 + $0x10] sm:$0xff] }
 0x1ad   :  { %v222_v33 = vmul.f32 %v221_v32, %v214_v22 }
 0x1af   :  { %224 = vrot.lane.b32.xlu1 %v222_v33, %s721_s13 }
 0x1b3   :  { %230 = vperm.xlu1 %632, %v221_v32  }
 0x221   :  { %v225_v34 = vpop.permute.xlu1 %224 }
 0x222   :  { %v227_v35 = vsub.f32 %v781_v30, %v225_v34 }
 0x224   :  { %239 = vperm.xlu0 %633, %v227_v35  }
 0x228   :  { %634 = vset.pattern.permute.xlu0 %v722_v2 }
 0x232   :  { %v231_v36 = vpop.permute.xlu1 %230 }
 0x233   :  { %v233_v37 = vmul.f32 %v231_v36, %v124_v6  ;;  %v234_v38 = vmul.f32 %v231_v36, %v126_v8  ;;  %v235_v39 = vmul.f32 %v231_v36, %v195_v9  ;;  %v236_v40 = vmul.f32 %v231_v36, %v197_v13 }
 0x234   :  { %v723_v13 = vmov 3  }
 0x2a3   :  { %v240_v41 = vpop.permute.xlu0 %239 }
 0x2a4   :  { %v242_v42 = vadd.f32 %v240_v41, %v233_v37  ;;  %v244_v43 = vadd.f32 %v240_v41, %v235_v39  ;;  %v243_v44 = vadd.f32 %v240_v41, %v234_v38  ;;  %v245_v45 = vadd.f32 %v240_v41, %v236_v40 }
 0x2a6   :  { %v246_v46 = vmax.f32 %v242_v42, 0.0  ;;  %v248_v47 = vmax.f32 %v244_v43, 0.0  ;;  %v247_v48 = vmax.f32 %v243_v44, 0.0  ;;  %v249_v49 = vmax.f32 %v245_v45, 0.0 }
 0x2a8   :  { %253 = vmatprep.subr.mxu0 %v247_v48  ;;  %324 = vmatprep.subr.mxu1 %v249_v49 }
 0x2a9   :  { %254 = vmatpush1.msra.mxu0 %v246_v46  ;;  %325 = vmatpush1.msra.mxu1 %v248_v47 }
 0x2aa   :  { %615 = vmatmul.mubr.msk.f32.vlgmr.msra.gmra.mrb[2].mxu0 %vm54_vm0, %v45_v50  ;;  %616 = vmatmul.mubr.msk.f32.vlgmr.msra.gmra.mrb[2].mxu1 %vm54_vm0, %v45_v50 }
 0x2ab   :  { %512 = vmatprep.mubr.f32.mxu0 %v718_v0  ;;  %583 = vmatprep.mubr.f32.mxu1 %v718_v0 }
 0x37d   :  { %v319_v51 = vpop.f32.mrb[2].mxu0  ;;  %v390_v52 = vpop.f32.mrb[2].mxu1 }
 0x37e   :  { %v400_v53 = vmul.f32 %v319_v51, %v319_v51  ;;  %v321_v54 = vpop.f32.mrb[3].mxu0  ;;  %v392_v55 = vpop.f32.mrb[3].mxu1  ;;  %v402_v58 = vmul.f32 %v390_v52, %v390_v52 }
 0x37f   :  { %v395_v56 = vadd.f32 %v321_v54, %v319_v51  ;;  %v401_v57 = vmul.f32 %v321_v54, %v321_v54  ;;  %v403_v62 = vmul.f32 %v392_v55, %v392_v55 }
 0x381   :  { %v396_v59 = vadd.f32 %v395_v56, %v390_v52  ;;  %v404_v60 = vadd.f32 %v401_v57, %v400_v53 }
 0x383   :  { %v397_v61 = vadd.f32 %v396_v59, %v392_v55  ;;  %v405_v63 = vadd.f32 %v404_v60, %v402_v58 }
 0x385   :  { %398 = vadd.xlane.f32.xlu1 %v397_v61  ;;  %v406_v1 = vadd.f32 %v405_v63, %v403_v62 }
 0x389   :  { %407 = vadd.xlane.f32.xlu1 %v406_v1 }
 0x412   :  { %v399_v3 = vpop.xlane.xlu1 %398 }
 0x413   :  { %v409_v0 = vmul.f32 0.001953125, %v399_v3 }
 0x415   :  { %v411_v5 = vmul.f32 %v409_v0, %v409_v0 }
 0x416   :  { %v408_v4 = vpop.xlane.xlu1 %407 }
 0x417   :  { %v410_v6 = vmul.f32 0.001953125, %v408_v4 }
 0x419   :  { %v412_v7 = vsub.f32 %v410_v6, %v411_v5 }
 0x41b   :  { %v413_v8 = vmax.f32 %v412_v7, 0.0 }
 0x41d   :  { %v414_v9 = vadd.f32 1e-05, %v413_v8 }
 0x41f   :  { %638 = vrsqrt.f32 %v414_v9 }
 0x429   :  { %v639_v10 = vpop.eup %638 }
 0x42a   :  { %v416_v11 = vmul.f32 %v639_v10, %v781_v30 }
 0x42c   :  { %425 = vperm.xlu0 %634, %v416_v11   ;;  %v417_v12 = vmul.f32 %v416_v11, %v409_v0 }
 0x42e   :  { %419 = vrot.lane.b32.xlu1 %v417_v12, %s721_s13 }
 0x430   :  { %635 = vset.pattern.permute.xlu0 %v723_v13 }
 0x4a0   :  { %v420_v14 = vpop.permute.xlu1 %419 }
 0x4a1   :  { %v422_v15 = vsub.f32 %v781_v30, %v420_v14 }
 0x4a3   :  { %434 = vperm.xlu0 %635, %v422_v15  }
 0x4ab   :  { %v426_v16 = vpop.permute.xlu0 %425 }
 0x4ac   :  { %v428_v17 = vmul.f32 %v426_v16, %v319_v51  ;;  %v429_v18 = vmul.f32 %v426_v16, %v321_v54  ;;  %v430_v19 = vmul.f32 %v426_v16, %v390_v52  ;;  %v431_v20 = vmul.f32 %v426_v16, %v392_v55 }
 0x522   :  { %v435_v21 = vpop.permute.xlu0 %434 }
 0x523   :  { %v437_v22 = vadd.f32 %v435_v21, %v428_v17  ;;  %v438_v23 = vadd.f32 %v435_v21, %v429_v18  ;;  %v439_v24 = vadd.f32 %v435_v21, %v430_v19  ;;  %v440_v25 = vadd.f32 %v435_v21, %v431_v20 }
 0x525   :  { %v441_v26 = vmax.f32 %v437_v22, 0.0  ;;  %v443_v27 = vmax.f32 %v439_v24, 0.0  ;;  %v442_v28 = vmax.f32 %v438_v23, 0.0  ;;  %v444_v29 = vmax.f32 %v440_v25, 0.0 }
 0x527   :  { %448 = vmatprep.subr.mxu0 %v442_v28  ;;  %519 = vmatprep.subr.mxu1 %v444_v29 }
 0x528   :  { %449 = vmatpush1.msra.mxu0 %v441_v26  ;;  %520 = vmatpush1.msra.mxu1 %v443_v27 }
 0x529   :  { %617 = vmatmul.mubr.msk.f32.vlgmr.msra.gmra.mrb[4].mxu0 %vm54_vm0, %v47_v31  ;;  %618 = vmatmul.mubr.msk.f32.vlgmr.msra.gmra.mrb[4].mxu1 %vm54_vm0, %v47_v31 }
 0x5fc   :  { %v514_v30 = vpop.f32.mrb[4].mxu0  ;;  %v585_v32 = vpop.f32.mrb[4].mxu1 }
 0x5fd   :  { %590 = vst [vmem:[#allocation7] sm:$0xff] %v514_v30  ;;  %593 = vst [vmem:[#allocation7 + $0x10] sm:$0xff] %v585_v32  ;;  %v516_v33 = vpop.f32.mrb[5].mxu0  ;;  %v587_v34 = vpop.f32.mrb[5].mxu1 }
 0x5fe   :  { %591 = vst [vmem:[#allocation7 + $0x8] sm:$0xff] %v516_v33  ;;  %594 = vst [vmem:[#allocation7 + $0x18] sm:$0xff] %v587_v34 }
 0x5ff   :  { %695 = shalt.err (!%p692_p6)
}
 0x600   :  { %s696_s18 = scalar_lea.hbm %s813_s3, 512 }
 0x601   :  { %p697_p7 = scmp.ne.s32.totalorder %s813_s3, %s696_s18  ;;  %p700_p8 = scmp.lt.u32.totalorder %s696_s18, %s813_s3 }
 0x603   :  { %p702_p9 = pnand %p700_p8, %p697_p7 }
 0x605   :  { %705 = shalt.err (!%p702_p9)
}
 0x606   :  { %606 = dma.vmem_to_hbm [thread:$0]  %s601_s14, 512, %s813_s3, [#allocation4], %s713_s22, %s713_s22, %s714_s23  }
 0x607   :  { %710 = dma.done.wait [#allocation4], 512  }
 0x608   :  { %711 = vsyncadd [#allocation4], 4294966784 }
 0x609   :  { %610 = vsyncpa [#allocation3], 1 }
 0x60a   :  { %611 = vsyncpa [#allocation6], 1 }
 0x60b   :  { %612 = vsyncpa [#allocation4], 1 }

</bundles_post_ra>
